<compile_context>
chip_gen: v5e
topology: v5e:2x2
jax: 0.10.0
libtpu: 0.0.40
codegen_flags: <defaults>
</compile_context>

<pallas_src>
import functools

import jax
import jax.numpy as jnp
from jax.experimental import pallas as pl
from jax.experimental.pallas import tpu as pltpu


def _round_up(x, m):
    return ((x + m - 1) // m) * m


def _round_down(x, m):
    return (x // m) * m


def _largest_divisor_tile(dim, target, multiple):
    """Largest t <= target that divides `dim` and is a multiple of `multiple`,
    or None if no such tile exists."""
    t = min(_round_down(target, multiple), _round_down(dim, multiple))
    while t >= multiple:
        if dim % t == 0:
            return t
        t -= multiple
    return None


def _vmem_budget_bytes():
    """Generation-aware VMEM budget (leave ~22% headroom for Mosaic scratch).

    v5e/v6e (128 MiB physical) -> ~100 MiB;  v7x (64 MiB) -> ~50 MiB.
    Falls back to a v7x-safe 50 MiB if the query is unavailable.
    """
    try:  # detection only; never masks kernel errors
        info = pltpu.get_tpu_info()
        phys = getattr(info, "vmem_capacity_bytes", None)
        if phys:
            return int(phys * 0.78)
    except Exception:
        pass
    return 50 * 1024 * 1024


def _ffn_kernel(x_ref, w1_ref, b1_ref, w2_ref, b2_ref, o_ref, *maybe_acc,
                compute_dtype):
    # x_ref : (tm, d_model)   w1_ref: (d_model, tk)   b1_ref: (1, tk)
    # w2_ref: (tk, d_model)   b2_ref: (1, d_model)    o_ref : (tm, d_model)
    # maybe_acc: () if o_ref (f32) is the accumulator, else (f32 VMEM scratch,)
    acc_ref = maybe_acc[0] if maybe_acc else o_ref
    k = pl.program_id(1)

    @pl.when(k == 0)
    def _zero_acc():
        acc_ref[...] = jnp.zeros_like(acc_ref)

    x = x_ref[...].astype(compute_dtype)
    # fc1 chunk on the MXU (f32 accumulation) + bias + ReLU in f32.
    h = jnp.dot(x, w1_ref[...], preferred_element_type=jnp.float32)
    h = jnp.maximum(h + b1_ref[...], 0.0)
    # Dropout is identity in inference mode.
    # fc2 partial product for this d_ff chunk, accumulated in f32.
    acc_ref[...] += jnp.dot(h.astype(compute_dtype), w2_ref[...],
                            preferred_element_type=jnp.float32)

    @pl.when(k == pl.num_programs(1) - 1)
    def _finalize():
        if maybe_acc:
            o_ref[...] = (acc_ref[...] + b2_ref[...]).astype(o_ref.dtype)
        else:
            o_ref[...] += b2_ref[...]


def position_wise_feed_forward(x, w1, b1, w2, b2, *, tm=None, tk=512,
                               compute_dtype=jnp.bfloat16, out_dtype=None):
    """x: (batch, seq, d_model). w1: (d_model, d_ff), w2: (d_ff, d_model).

    compute_dtype: dtype fed to the MXU (default bf16). Accumulation, bias
    adds and ReLU are always f32. out_dtype defaults to x.dtype.
    tm=None -> auto (largest row tile fitting the VMEM budget, >= 2 tiles).
    """
    batch, seq, d_model = x.shape
    d_ff = w1.shape[1]
    assert w1.shape == (d_model, d_ff)
    assert w2.shape == (d_ff, d_model)

    compute_dtype = jnp.dtype(compute_dtype)
    out_dtype = jnp.dtype(out_dtype) if out_dtype is not None else x.dtype

    x_isz = jnp.dtype(x.dtype).itemsize
    c_isz = compute_dtype.itemsize
    o_isz = out_dtype.itemsize

    M = batch * seq

    # Sublane alignment: 8 for 32-bit blocks, 16 for bf16, 32 for fp8/int8.
    min_isz = min(x_isz, c_isz, o_isz)
    row_align = {4: 8, 2: 16, 1: 32}.get(min_isz, 8)

    # ---- d_ff chunk: lane-aligned divisor of d_ff ---------------------------
    tk_eff = _largest_divisor_tile(d_ff, tk, 128) or d_ff
    num_k = d_ff // tk_eff

    fuse_acc_into_out = (out_dtype == jnp.dtype(jnp.float32))
    acc_row_bytes = 0 if fuse_acc_into_out else d_model * 4

    # ---- row tile: VMEM-budgeted, >= 2 tiles for megacore, divisor of M ----
    budget = _vmem_budget_bytes()
    fixed_bytes = (2 * (d_model * tk_eff + tk_eff * d_model) * c_isz  # W1+W2 (dbl buf)
                   + 2 * (tk_eff + d_model) * 4)                      # biases (f32)
    per_row_bytes = (2 * d_model * x_isz        # x tiles (double buffered)
                     + 2 * d_model * o_isz      # out tiles (double buffered)
                     + acc_row_bytes            # f32 scratch acc (if any)
                     + tk_eff * (4 + c_isz)     # h (f32) + cast copy
                     + d_model * c_isz)         # in-kernel x cast
    tm_vmem = max(row_align, (budget - fixed_bytes) // max(per_row_bytes, 1))
    tm_target = tm if tm is not None else 1024
    tm_cap = max(row_align, min(int(tm_target), int(tm_vmem)))
    tm_cap = min(tm_cap, _round_up(M, row_align))
    if M >= 2 * row_align:
        # keep at least two row tiles so the parallel axis shards across TCs
        tm_cap = min(tm_cap, _round_up((M + 1) // 2, row_align))
    tm_cap = max(row_align, _round_down(tm_cap, row_align))

    tm_eff = _largest_divisor_tile(M, tm_cap, row_align)
    if tm_eff is not None:
        M_pad = M                                  # exact divisor: no padding
    else:
        tm_eff = tm_cap
        M_pad = _round_up(M, tm_eff)
    num_m = M_pad // tm_eff

    # ---- operands (no wrapper-side cast of x; weights cast only if needed) --
    x2d = x.reshape(M, d_model)
    if M_pad != M:
        x2d = jnp.pad(x2d, ((0, M_pad - M), (0, 0)))
    w1c = w1 if w1.dtype == compute_dtype else w1.astype(compute_dtype)
    w2c = w2 if w2.dtype == compute_dtype else w2.astype(compute_dtype)
    b1_2d = b1.reshape(1, d_ff).astype(jnp.float32)
    b2_2d = b2.reshape(1, d_model).astype(jnp.float32)

    vmem_est = fixed_bytes + tm_eff * per_row_bytes
    vmem_limit = int(min(budget,
                         max(32 * 1024 * 1024, int(1.3 * vmem_est) + (8 << 20))))

    cost = pl.CostEstimate(
        flops=int(4 * M_pad * d_model * d_ff),
        transcendentals=0,
        bytes_accessed=int(M_pad * d_model * x_isz                 # x
                           + num_m * 2 * d_model * d_ff * c_isz    # W1+W2 re-streamed
                           + (d_ff + d_model) * 4                  # biases
                           + M_pad * d_model * o_isz),             # out
    )

    kernel = functools.partial(_ffn_kernel, compute_dtype=compute_dtype)
    scratch_shapes = ([] if fuse_acc_into_out
                      else [pltpu.VMEM((tm_eff, d_model), jnp.float32)])

    grid_spec = pltpu.PrefetchScalarGridSpec(
        num_scalar_prefetch=0,
        grid=(num_m, num_k),
        in_specs=[
            pl.BlockSpec((tm_eff, d_model), lambda i, k: (i, 0)),   # x
            pl.BlockSpec((d_model, tk_eff), lambda i, k: (0, k)),   # W1
            pl.BlockSpec((1, tk_eff), lambda i, k: (0, k)),         # b1
            pl.BlockSpec((tk_eff, d_model), lambda i, k: (k, 0)),   # W2
            pl.BlockSpec((1, d_model), lambda i, k: (0, 0)),        # b2
        ],
        out_specs=pl.BlockSpec((tm_eff, d_model), lambda i, k: (i, 0)),
        scratch_shapes=scratch_shapes,
    )

    out2d = pl.pallas_call(
        kernel,
        out_shape=jax.ShapeDtypeStruct((M_pad, d_model), out_dtype),
        grid_spec=grid_spec,
        compiler_params=pltpu.CompilerParams(
            dimension_semantics=("parallel", "arbitrary"),
            vmem_limit_bytes=vmem_limit,
        ),
        cost_estimate=cost,
    )(x2d, w1c, b1_2d, w2c, b2_2d)

    if M_pad != M:
        out2d = out2d[:M]
    return out2d.reshape(batch, seq, d_model)


def _init_linear_params(key, in_features, out_features, dtype=jnp.float32):
    """Deterministic init matching torch.nn.Linear's U(-1/sqrt(in), 1/sqrt(in))."""
    kw, kb = jax.random.split(key)
    bound = 1.0 / (in_features ** 0.5)
    # Stored as (in, out) == torch weight (out, in) transposed.
    w = jax.random.uniform(kw, (in_features, out_features), dtype, -bound, bound)
    b = jax.random.uniform(kb, (out_features,), dtype, -bound, bound)
    return w, b


def _reference(x, w1, b1, w2, b2):
    h = jnp.maximum(x @ w1 + b1, 0.0)
    return h @ w2 + b2


if __name__ == "__main__":
    batch, seq = 2, 64
    d_model, d_ff = 128, 256

    key = jax.random.PRNGKey(0)
    kx, k1, k2 = jax.random.split(key, 3)

    x = jax.random.normal(kx, (batch, seq, d_model), jnp.float32)
    w1, b1 = _init_linear_params(k1, d_model, d_ff)
    w2, b2 = _init_linear_params(k2, d_ff, d_model)

    ref = _reference(x, w1, b1, w2, b2)

    # 1) f32 MXU path (exact vs reference), fused f32 accumulation into o_ref.
    out = position_wise_feed_forward(x, w1, b1, w2, b2,
                                     compute_dtype=jnp.float32)
    out = jax.block_until_ready(out)
    assert out.shape == (batch, seq, d_model)
    assert jnp.allclose(out, ref, atol=1e-4, rtol=1e-4), "f32 mismatch vs reference"

    # 2) Exercise the d_ff reduction axis (tk=128 -> 2 k steps) in f32.
    out_tk = position_wise_feed_forward(x, w1, b1, w2, b2, tk=128,
                                        compute_dtype=jnp.float32)
    out_tk = jax.block_until_ready(out_tk)
    assert jnp.allclose(out_tk, ref, atol=1e-4, rtol=1e-4), "tiled-d_ff mismatch"

    # 3) Default bf16 MXU path with f32 accumulation (looser tolerance).
    out_bf16 = position_wise_feed_forward(x, w1, b1, w2, b2)
    out_bf16 = jax.block_until_ready(out_bf16)
    assert out_bf16.shape == (batch, seq, d_model)
    assert jnp.allclose(out_bf16.astype(jnp.float32), ref, atol=5e-2, rtol=5e-2), \
        "bf16-compute mismatch vs reference"

    # 4) Non-f32 output path (scratch accumulator variant).
    out_o16 = position_wise_feed_forward(x, w1, b1, w2, b2,
                                         compute_dtype=jnp.float32,
                                         out_dtype=jnp.bfloat16)
    out_o16 = jax.block_until_ready(out_o16)
    assert out_o16.dtype == jnp.bfloat16
    assert jnp.allclose(out_o16.astype(jnp.float32), ref, atol=2e-2, rtol=2e-2), \
        "bf16-output mismatch vs reference"

    print("KERNEL_OK")
</pallas_src>

<mosaic_0001>
module attributes {stable_mosaic.version = 11 : i64} {
  func.func @_ffn_kernel(%arg0: i32, %arg1: i32, %arg2: memref<64x128xf32, #tpu.memory_space<vmem>>, %arg3: memref<128x256xf32, #tpu.memory_space<vmem>>, %arg4: memref<1x256xf32, #tpu.memory_space<vmem>>, %arg5: memref<256x128xf32, #tpu.memory_space<vmem>>, %arg6: memref<1x128xf32, #tpu.memory_space<vmem>>, %arg7: memref<64x128xf32, #tpu.memory_space<vmem>>) attributes {dimension_semantics = [#tpu.dimension_semantics<parallel>, #tpu.dimension_semantics<arbitrary>], iteration_bounds = array<i64: 2, 1>, scalar_prefetch = 0 : i64, scratch_operands = 0 : i64, tpu.core_type = #tpu.core_type<tc>, window_params = [{transform_indices = @transform_0, window_bounds = array<i64: 64, 128>}, {transform_indices = @transform_1, window_bounds = array<i64: 128, 256>}, {transform_indices = @transform_2, window_bounds = array<i64: 1, 256>}, {transform_indices = @transform_3, window_bounds = array<i64: 256, 128>}, {pipeline_mode = #tpu.pipeline_mode<synchronous>, transform_indices = @transform_4, window_bounds = array<i64: 1, 128>}, {transform_indices = @transform_5, window_bounds = array<i64: 64, 128>}]} {
    %c0_i32 = arith.constant 0 : i32
    %0 = arith.cmpi eq, %arg1, %c0_i32 : i32
    %1 = arith.extui %0 : i1 to i32
    %c0_i32_0 = arith.constant 0 : i32
    %2 = arith.cmpi ne, %1, %c0_i32_0 : i32
    scf.if %2 {
      %cst_16 = arith.constant 0.000000e+00 : f32
      %19 = vector.broadcast %cst_16 : f32 to vector<64x128xf32>
      %c0_17 = arith.constant 0 : index
      %c0_18 = arith.constant 0 : index
      %20 = vector.load %arg7[%c0_17, %c0_18] : memref<64x128xf32, #tpu.memory_space<vmem>>, vector<64x128xf32>
      tpu.vector_store %arg7[%c0_17, %c0_18], %19 {strides = array<i32>} : memref<64x128xf32, #tpu.memory_space<vmem>>, vector<64x128xf32>,
    } else {
    }
    %c0 = arith.constant 0 : index
    %c0_1 = arith.constant 0 : index
    %3 = vector.load %arg2[%c0, %c0_1] : memref<64x128xf32, #tpu.memory_space<vmem>>, vector<64x128xf32>
    %c0_2 = arith.constant 0 : index
    %c0_3 = arith.constant 0 : index
    %4 = vector.load %arg3[%c0_2, %c0_3] : memref<128x256xf32, #tpu.memory_space<vmem>>, vector<128x256xf32>
    %cst = arith.constant dense<0.000000e+00> : vector<64x256xf32>
    %5 = tpu.matmul %3, %4, %cst {dimension_numbers = #tpu.dot_dimension_numbers<[1], [0], [0], [1], [0, 0, 1, 1], [], []>} : vector<64x128xf32>, vector<128x256xf32>, vector<64x256xf32> -> vector<64x256xf32>
    %c0_4 = arith.constant 0 : index
    %c0_5 = arith.constant 0 : index
    %6 = vector.load %arg4[%c0_4, %c0_5] : memref<1x256xf32, #tpu.memory_space<vmem>>, vector<1x256xf32>
    %7 = vector.broadcast %6 : vector<1x256xf32> to vector<64x256xf32>
    %8 = arith.addf %5, %7 : vector<64x256xf32>
    %cst_6 = arith.constant 0.000000e+00 : f32
    %9 = vector.broadcast %cst_6 : f32 to vector<64x256xf32>
    %10 = arith.maximumf %8, %9 : vector<64x256xf32>
    %c0_7 = arith.constant 0 : index
    %c0_8 = arith.constant 0 : index
    %11 = vector.load %arg7[%c0_7, %c0_8] : memref<64x128xf32, #tpu.memory_space<vmem>>, vector<64x128xf32>
    %c0_9 = arith.constant 0 : index
    %c0_10 = arith.constant 0 : index
    %12 = vector.load %arg5[%c0_9, %c0_10] : memref<256x128xf32, #tpu.memory_space<vmem>>, vector<256x128xf32>
    %cst_11 = arith.constant dense<0.000000e+00> : vector<64x128xf32>
    %13 = tpu.matmul %10, %12, %cst_11 {dimension_numbers = #tpu.dot_dimension_numbers<[1], [0], [0], [1], [0, 0, 1, 1], [], []>} : vector<64x256xf32>, vector<256x128xf32>, vector<64x128xf32> -> vector<64x128xf32>
    %14 = arith.addf %11, %13 : vector<64x128xf32>
    %c0_12 = arith.constant 0 : index
    %c0_13 = arith.constant 0 : index
    %15 = vector.load %arg7[%c0_12, %c0_13] : memref<64x128xf32, #tpu.memory_space<vmem>>, vector<64x128xf32>
    tpu.vector_store %arg7[%c0_12, %c0_13], %14 {strides = array<i32>} : memref<64x128xf32, #tpu.memory_space<vmem>>, vector<64x128xf32>,
    %c0_i32_14 = arith.constant 0 : i32
    %16 = arith.cmpi eq, %arg1, %c0_i32_14 : i32
    %17 = arith.extui %16 : i1 to i32
    %c0_i32_15 = arith.constant 0 : i32
    %18 = arith.cmpi ne, %17, %c0_i32_15 : i32
    scf.if %18 {
      %c0_16 = arith.constant 0 : index
      %c0_17 = arith.constant 0 : index
      %19 = vector.load %arg7[%c0_16, %c0_17] : memref<64x128xf32, #tpu.memory_space<vmem>>, vector<64x128xf32>
      %c0_18 = arith.constant 0 : index
      %c0_19 = arith.constant 0 : index
      %20 = vector.load %arg6[%c0_18, %c0_19] : memref<1x128xf32, #tpu.memory_space<vmem>>, vector<1x128xf32>
      %21 = vector.broadcast %20 : vector<1x128xf32> to vector<64x128xf32>
      %22 = arith.addf %19, %21 : vector<64x128xf32>
      %c0_20 = arith.constant 0 : index
      %c0_21 = arith.constant 0 : index
      %23 = vector.load %arg7[%c0_20, %c0_21] : memref<64x128xf32, #tpu.memory_space<vmem>>, vector<64x128xf32>
      tpu.vector_store %arg7[%c0_20, %c0_21], %22 {strides = array<i32>} : memref<64x128xf32, #tpu.memory_space<vmem>>, vector<64x128xf32>,
    } else {
    }
    return
  }
  func.func @transform_0(%arg0: i32, %arg1: i32) -> (i32, i32) {
    %c0_i32 = arith.constant 0 : i32
    %c0_i32_0 = arith.constant 0 : i32
    return %arg0, %c0_i32 : i32, i32
  }
  func.func @transform_1(%arg0: i32, %arg1: i32) -> (i32, i32) {
    %c0_i32 = arith.constant 0 : i32
    %c0_i32_0 = arith.constant 0 : i32
    return %c0_i32, %arg1 : i32, i32
  }
  func.func @transform_2(%arg0: i32, %arg1: i32) -> (i32, i32) {
    %c0_i32 = arith.constant 0 : i32
    %c0_i32_0 = arith.constant 0 : i32
    return %c0_i32, %arg1 : i32, i32
  }
  func.func @transform_3(%arg0: i32, %arg1: i32) -> (i32, i32) {
    %c0_i32 = arith.constant 0 : i32
    %c0_i32_0 = arith.constant 0 : i32
    return %arg1, %c0_i32 : i32, i32
  }
  func.func @transform_4(%arg0: i32, %arg1: i32) -> (i32, i32) {
    %c0_i32 = arith.constant 0 : i32
    %c0_i32_0 = arith.constant 0 : i32
    %c0_i32_1 = arith.constant 0 : i32
    return %c0_i32, %c0_i32_0 : i32, i32
  }
  func.func @transform_5(%arg0: i32, %arg1: i32) -> (i32, i32) {
    %c0_i32 = arith.constant 0 : i32
    %c0_i32_0 = arith.constant 0 : i32
    return %arg0, %c0_i32 : i32, i32
  }
}

</mosaic_0001>

<bundles_post_ra>
// kernel: tpu_custom_call.1
= control target key start
LH: loop header
LB: loop body
LE: loop exit
PB: predicated region body
PF: predicated region fallthrough
CT: control target
= control target key end

     0   :  { %s1370_s0 = inlined_call_operand.hbm [shape: f32[128,128], index: 0, kind: input, shape index: {}]   ;;  %s1371_s1 = inlined_call_operand.hbm [shape: f32[128,256], index: 1, kind: input, shape index: {}]   ;;  %s1372_s2 = inlined_call_operand.hbm [shape: f32[1,256], index: 2, kind: input, shape index: {}]   ;;  %s1373_s3 = inlined_call_operand.hbm [shape: f32[256,128], index: 3, kind: input, shape index: {}]   ;;  %s1374_s4 = inlined_call_operand.vmem [shape: f32[1,128], index: 4, kind: input, shape index: {}]   ;;  %s1375_s5 = inlined_call_operand.hbm [shape: f32[128,128], index: 5, kind: output, shape index: {}]  }
   0x1   :  { %1378 = sst [smem:[#allocation15_spill]] %s1371_s1 }
   0x2   :  { %1379 = sst [smem:[#allocation16_spill]] %s1372_s2 }
   0x3   :  { %1380 = sst [smem:[#allocation17_spill]] %s1373_s3 }
   0x4   :  { %10 = vsyncpa [#allocation3], 0 }
   0x5   :  { %12 = vsyncpa [#allocation3 + $0x1], 0 }
   0x6   :  { %13 = vsyncpa [#allocation6], 0 }
   0x7   :  { %14 = vsyncpa [#allocation9], 0 }
   0x8   :  { %15 = vsyncpa [#allocation4], 0 }
   0x9   :  { %17 = vsyncpa [#allocation4 + $0x1], 0  ;;  %s1165_s18 = smov 0   ;;  %s1167_s19 = smov 0  }
   0xa   :  { %s1169_s20 = smov 0   ;;  %s1171_s21 = smov 0  }
   0xb   :  { %s1173_s22 = smov 0   ;;  %s1175_s23 = smov 0  }
   0xc LB: > { %s790_s24 = sadd.s32 4294967295, %s1124_s23   ;;  %s791_s25 = sadd.s32 4294967294, %s1124_s23   ;;  %s1124_s23 = sphi %s1175_s23, %s23_s23   ;;  %s1120_s22 = sphi %s1173_s22, %s1398_s22   ;;  %s1116_s21 = sphi %s1171_s21, %s1397_s21   ;;  %s1112_s20 = sphi %s1169_s20, %s1396_s20   ;;  %s1108_s19 = sphi %s1167_s19, %s1395_s19   ;;  %s1104_s18 = sphi %s1165_s18, %s1394_s18  }
   0xd   : > { %p55_p0 = scmp.ne.s32.totalorder %s1108_s19, %s1104_s18  ;;  %p1199_p1 = scmp.eq.s32.totalorder %s790_s24, 0 }
   0xe   : > { %p1203_p2 = scmp.eq.s32.totalorder %s790_s24, 1  ;;  %p184_p3 = scmp.eq.s32.totalorder %s791_s25, 1 }
   0xf   : > { %p1209_p4 = por %p1199_p1, %p55_p0  ;;  %p792_p5 = scmp.ge.s32.totalorder %s1124_s23, 1 }
  0x10   : > { %p1214_p6 = por %p184_p3, %p55_p0  ;;  %p191_p7 = scmp.lt.s32.totalorder %s1124_s23, 3 }
  0x11   : > { %s1385_s1 = sld [smem:[#allocation15_spill]]  ;;  %s1126_s9 = smov [#allocation5]  }
  0x12   : > { %p1222_p8 = pnand %p792_p5, %p191_p7  ;;  %s207_s10 = sshll.u32 %s1126_s9, 4  ;;  %s208_s10 = int_to_ptr.vmem [resolvable:$true] %s207_s10 }
  0x13   : > { %p796_p11 = scmp.ge.s32.totalorder %s1124_s23, 2  ;;  %s1388_s2 = sld [smem:[#allocation16_spill]] }
  0x14   : > { %p829_p9 = pneg %p1222_p8  ;;  %s1127_s15 = smov 256  }
  0x15   : > { %s1128_s16 = smov 16   ;;  %s1129_s17 = smov [#allocation7]  }
  0x16   : > { %p1230_p10 = pnand %p829_p9, %p1199_p1  ;;  %s224_s24 = sshll.u32 %s1129_s17, 4  ;;  %s225_s24 = int_to_ptr.vmem [resolvable:$true] %s224_s24 }
  0x17   : > { %s205_s7 = sshll.u32 %s1385_s1, 4  ;;  %s1389_s3 = sld [smem:[#allocation17_spill]]  ;;  %s206_s7 = int_to_ptr.hbm [resolvable:$true] %s205_s7 }
  0x18   : > { %832 = dma.hbm_to_vmem [thread:$0]  (!%p1230_p10), %s206_s7, 4096, %s208_s10, [#allocation6], %s1127_s15, %s1127_s15, %s1128_s16  }
  0x19   : > { %s222_s14 = sshll.u32 %s1388_s2, 4  ;;  %s1130_s9 = smov [#allocation8]   ;;  %s223_s14 = int_to_ptr.hbm [resolvable:$true] %s222_s14 }
  0x1a   : > { %835 = dma.hbm_to_vmem [thread:$0]  (!%p1230_p10), %s223_s14, 32, %s225_s24, [#allocation6]  }
  0x1b   : > { %s238_s12 = sshll.u32 %s1130_s9, 4  ;;  %s1376_s13 = smov 128   ;;  %s239_s12 = int_to_ptr.vmem [resolvable:$true] %s238_s12 }
  0x1c   : > { %s1377_s7 = smov 8   ;;  %s42_s10 = sadd.s32 1, %s1112_s20 }
  0x1d   : > { %s236_s6 = sshll.u32 %s1389_s3, 4  ;;  %s35_s15 = sadd.s32 1, %s1120_s22  ;;  %s237_s6 = int_to_ptr.hbm [resolvable:$true] %s236_s6 }
  0x1e   : > { %838 = dma.hbm_to_vmem [thread:$0]  (!%p1230_p10), %s237_s6, 4096, %s239_s12, [#allocation9], %s1376_s13, %s1376_s13, %s1377_s7  }
  0x1f   : > { %p49_p12 = scmp.ne.s32.totalorder %s1112_s20, %s1108_s19  ;;  %p37_p13 = scmp.ge.s32.totalorder %s35_s15, 2 }
  0x20   : > { %p50_p0 = scmp.eq.s32.totalorder %s1124_s23, 0  ;;  %p850_p5 = scmp.lt.s32.totalorder %s1124_s23, 2 }
  0x21   : > { %p1257_p3 = por %p1203_p2, %p49_p12  ;;  %s1400_s15 = smov (%p37_p13, %s35_s15), 0 }
  0x22   : > { %p1264_p7 = por %p50_p0, %p49_p12  ;;  %s255_s16 = sand.u32 1, %s1112_s20  }
  0x23   : > { %s39_s17 = ssub.s32 %s1120_s22, %s1400_s15  ;;  %s797_s24 = sshll.u32 %s255_s16, 6 }
  0x24   : > { %p40_p9 = scmp.eq.s32.totalorder %s39_s17, 0  ;;  %s811_s25 = sshll.u32 %s1120_s22, 6 }
  0x25   : > { %s264_s9 = scalar_lea.hbm %s1370_s0, %s811_s25  ;;  %s259_s12 = scalar_lea.vmem [#allocation2], %s797_s24 }
  0x26   : > { %s1273_s27 = scalar_select %p40_p9, %s1112_s20, %s42_s10  }
  0x27   : > { %s267_s13 = sshll.u32 %s259_s12, 4  ;;  %s265_s7 = sshll.u32 %s264_s9, 4  ;;  %s268_s13 = int_to_ptr.vmem [resolvable:$true] %s267_s13  ;;  %s266_s7 = int_to_ptr.hbm [resolvable:$true] %s265_s7 }
  0x28   : > { %p840_p2 = pnand %p850_p5, %p1264_p7  ;;  %s256_s1 = scalar_lea.sflag [#allocation3], %s255_s16 }
  0x29   : > { %s1392_s2 = smov 8   ;;  %s1393_s3 = smov 128  }
  0x2a   : > { %842 = dma.hbm_to_vmem [thread:$0]  (!%p840_p2), %s266_s7, 1024, %s268_s13, %s256_s1, %s1393_s3, %s1393_s3, %s1392_s2  }
  0x2b   : > { %279 = sbr.rel (%p1222_p8) target bundleno = 411 (0x19b), region = 40  ;;  %s1288_s10 = sand.u32 (!%p1222_p8), 1, %s1108_s19  }
  0x2c   : > { %s801_s17 = sshll.u32 (!%p1222_p8), %s1288_s10, 6  ;;  %s282_s24 = scalar_lea.sflag (!%p1222_p8), [#allocation3], %s1288_s10 }
  0x2d   : > { %s1294_s11 = scalar_lea.vmem (!%p1222_p8), [#allocation2], %s801_s17 }
  0x30   : > { %1087 = dma.done.wait (%p1209_p4), %s282_s24, 1024  }
  0x31   : > { %1089 = vsyncadd (%p1209_p4), %s282_s24, 4294966272 }
  0x32   : > { %1091 = dma.done.wait (%p1199_p1), [#allocation6], 4128  }
  0x33   : > { %1093 = vsyncadd (%p1199_p1), [#allocation6], 4294963168 }
  0x34   : > { %1095 = dma.done.wait (%p1199_p1), [#allocation9], 4096  }
  0x35   : > { %1097 = vsyncadd (%p1199_p1), [#allocation9], 4294963200  ;;  %v383_v0 = vld [vmem:[#allocation5 + $0xf0] sm:$0xff]  ;;  %v384_v1 = vld [vmem:[#allocation5 + $0xf8] sm:$0xff]  ;;  %s1321_s3 = scalar_lea.vmem [#allocation10], %s801_s17  ;;  %s812_s26 = sshll.u32 %s1116_s21, 6 }
  0x36   : > { %v381_v2 = vld [vmem:[#allocation5 + $0xe0] sm:$0xff]  ;;  %391 = vmatpush.msra.mxu0 %v383_v0  ;;  %432 = vmatpush.msra.mxu1 %v384_v1  ;;  %v382_v3 = vld [vmem:[#allocation5 + $0xe8] sm:$0xff]  ;;  %v379_v4 = vld [vmem:[#allocation5 + $0xd0] sm:$0xff]  ;;  %s670_s13 = scalar_lea.hbm %s1375_s5, %s812_s26  ;;  %s671_s7 = sshll.u32 %s1321_s3, 4  ;;  %s672_s7 = int_to_ptr.vmem [resolvable:$true] %s671_s7 }
  0x37   : > { %v380_v5 = vld [vmem:[#allocation5 + $0xd8] sm:$0xff]  ;;  %v377_v6 = vld [vmem:[#allocation5 + $0xc0] sm:$0xff]  ;;  %v378_v7 = vld [vmem:[#allocation5 + $0xc8] sm:$0xff]  ;;  %s673_s16 = sshll.u32 %s670_s13, 4  ;;  %s659_s25 = scalar_lea.sflag [#allocation4], %s1288_s10  ;;  %s674_s16 = int_to_ptr.hbm [resolvable:$true] %s673_s16 }
  0x38   : > { %392 = vmatpush.msra.mxu0 %v381_v2  ;;  %433 = vmatpush.msra.mxu1 %v382_v3  ;;  %v375_v8 = vld [vmem:[#allocation5 + $0xb0] sm:$0xff]  ;;  %v376_v9 = vld [vmem:[#allocation5 + $0xb8] sm:$0xff]  ;;  %v373_v10 = vld [vmem:[#allocation5 + $0xa0] sm:$0xff]  ;;  %s1048_s30 = sshra.s32 %s674_s16, 4  ;;  %s1054_s12 = scalar_lea.hbm %s1375_s5, 128  ;;  %s1049_s30 = int_to_ptr.hbm [resolvable:$true] %s1048_s30 }
  0x39   : > { %v374_v11 = vld [vmem:[#allocation5 + $0xa8] sm:$0xff]  ;;  %v371_v12 = vld [vmem:[#allocation5 + $0x90] sm:$0xff]  ;;  %v372_v13 = vld [vmem:[#allocation5 + $0x98] sm:$0xff]  ;;  %s1050_s21 = scalar_lea.hbm %s1049_s30, 64  ;;  %p1055_p10 = scmp.lt.s32.totalorder %s1049_s30, %s1375_s5 }
  0x3a   : > { %393 = vmatpush.msra.mxu0 %v379_v4  ;;  %434 = vmatpush.msra.mxu1 %v380_v5  ;;  %v369_v14 = vld [vmem:[#allocation5 + $0x80] sm:$0xff]  ;;  %v370_v15 = vld [vmem:[#allocation5 + $0x88] sm:$0xff]  ;;  %v367_v16 = vld [vmem:[#allocation5 + $0x70] sm:$0xff]  ;;  %p1051_p1 = scmp.ne.s32.totalorder %s1049_s30, %s1050_s21  ;;  %p1056_p12 = scmp.lt.s32.totalorder %s1054_s12, %s1050_s21 }
  0x3b   : > { %v368_v17 = vld [vmem:[#allocation5 + $0x78] sm:$0xff]  ;;  %v365_v18 = vld [vmem:[#allocation5 + $0x60] sm:$0xff]  ;;  %v366_v19 = vld [vmem:[#allocation5 + $0x68] sm:$0xff] }
  0x3c   : > { %394 = vmatpush.msra.mxu0 %v377_v6  ;;  %435 = vmatpush.msra.mxu1 %v378_v7  ;;  %v363_v20 = vld [vmem:[#allocation5 + $0x50] sm:$0xff]  ;;  %v364_v21 = vld [vmem:[#allocation5 + $0x58] sm:$0xff]  ;;  %v361_v22 = vld [vmem:[#allocation5 + $0x40] sm:$0xff]  ;;  %p1052_p4 = pnand %p1051_p1, %p1257_p3  ;;  %p1057_p13 = por %p1056_p12, %p1055_p10 }
  0x3d   : > { %v362_v23 = vld [vmem:[#allocation5 + $0x48] sm:$0xff]  ;;  %v359_v24 = vld [vmem:[#allocation5 + $0x30] sm:$0xff]  ;;  %v360_v25 = vld [vmem:[#allocation5 + $0x38] sm:$0xff] }
  0x3e   : > { %395 = vmatpush.msra.mxu0 %v375_v8  ;;  %436 = vmatpush.msra.mxu1 %v376_v9  ;;  %v357_v26 = vld [vmem:[#allocation5 + $0x20] sm:$0xff]  ;;  %v358_v27 = vld [vmem:[#allocation5 + $0x28] sm:$0xff]  ;;  %v355_v28 = vld [vmem:[#allocation5 + $0x10] sm:$0xff]  ;;  %p1053_p8 = pneg %p1052_p4 }
  0x3f   : > { %v356_v29 = vld [vmem:[#allocation5 + $0x18] sm:$0xff]  ;;  %v353_v30 = vld [vmem:[#allocation5] sm:$0xff]  ;;  %v354_v31 = vld [vmem:[#allocation5 + $0x8] sm:$0xff] }
  0x40   : > { %396 = vmatpush.msra.mxu0 %v373_v10  ;;  %437 = vmatpush.msra.mxu1 %v374_v11  ;;  %v345_v32 = vld [vmem:[%s1294_s11] sm:$0xff]  ;;  %v346_v33 = vld [vmem:[%s1294_s11 + $0x8] sm:$0xff]  ;;  %v347_v34 = vld [vmem:[%s1294_s11 + $0x10] sm:$0xff]  ;;  %p1058_p0 = pnand %p1057_p13, %p1053_p8 }
  0x41   : > { %v348_v35 = vld [vmem:[%s1294_s11 + $0x18] sm:$0xff]  ;;  %v510_v40 = vld [vmem:[#allocation8 + $0x68] sm:$0xff]  ;;  %v509_v42 = vld [vmem:[#allocation8 + $0x60] sm:$0xff] }
  0x42   : > { %397 = vmatpush.msra.mxu0 %v371_v12  ;;  %438 = vmatpush.msra.mxu1 %v372_v13  ;;  %v512_v36 = vld [vmem:[#allocation8 + $0x78] sm:$0xff]  ;;  %v511_v38 = vld [vmem:[#allocation8 + $0x70] sm:$0xff]  ;;  %v526_v41 = vld [vmem:[#allocation8 + $0xe8] sm:$0xff] }
  0x43   : > { %v528_v37 = vld [vmem:[#allocation8 + $0xf8] sm:$0xff]  ;;  %529 = vmatpush.msra.mxu2 %v512_v36  ;;  %v527_v39 = vld [vmem:[#allocation8 + $0xf0] sm:$0xff]  ;;  %v525_v43 = vld [vmem:[#allocation8 + $0xe0] sm:$0xff] }
  0x44   : > { %398 = vmatpush.msra.mxu0 %v369_v14  ;;  %439 = vmatpush.msra.mxu1 %v370_v15  ;;  %v349_v44 = vld [vmem:[%s1294_s11 + $0x20] sm:$0xff]  ;;  %v507_v47 = vld [vmem:[#allocation8 + $0x50] sm:$0xff]  ;;  %v506_v49 = vld [vmem:[#allocation8 + $0x48] sm:$0xff] }
  0x45   : > { %570 = vmatpush.msra.mxu3 %v528_v37  ;;  %530 = vmatpush.msra.mxu2 %v511_v38  ;;  %v508_v45 = vld [vmem:[#allocation8 + $0x58] sm:$0xff]  ;;  %v523_v48 = vld [vmem:[#allocation8 + $0xd0] sm:$0xff]  ;;  %v522_v50 = vld [vmem:[#allocation8 + $0xc8] sm:$0xff] }
  0x46   : > { %399 = vmatpush.msra.mxu0 %v367_v16  ;;  %440 = vmatpush.msra.mxu1 %v368_v17  ;;  %v524_v46 = vld [vmem:[#allocation8 + $0xd8] sm:$0xff]  ;;  %v505_v51 = vld [vmem:[#allocation8 + $0x40] sm:$0xff]  ;;  %v503_v56 = vld [vmem:[#allocation8 + $0x30] sm:$0xff] }
  0x47   : > { %571 = vmatpush.msra.mxu3 %v527_v39  ;;  %531 = vmatpush.msra.mxu2 %v510_v40  ;;  %v521_v52 = vld [vmem:[#allocation8 + $0xc0] sm:$0xff]  ;;  %v504_v54 = vld [vmem:[#allocation8 + $0x38] sm:$0xff]  ;;  %v519_v57 = vld [vmem:[#allocation8 + $0xb0] sm:$0xff] }
  0x48   : > { %400 = vmatpush.msra.mxu0 %v365_v18  ;;  %441 = vmatpush.msra.mxu1 %v366_v19  ;;  %v350_v53 = vld [vmem:[%s1294_s11 + $0x28] sm:$0xff]  ;;  %v520_v55 = vld [vmem:[#allocation8 + $0xb8] sm:$0xff]  ;;  %v351_v62 = vld [vmem:[%s1294_s11 + $0x30] sm:$0xff] }
  0x49   : > { %572 = vmatpush.msra.mxu3 %v526_v41  ;;  %532 = vmatpush.msra.mxu2 %v509_v42  ;;  %v502_v58 = vld [vmem:[#allocation8 + $0x28] sm:$0xff]  ;;  %v501_v60 = vld [vmem:[#allocation8 + $0x20] sm:$0xff]  ;;  %v500_v63 = vld [vmem:[#allocation8 + $0x18] sm:$0xff] }
  0x4a   : > { %401 = vmatpush.msra.mxu0 %v363_v20  ;;  %442 = vmatpush.msra.mxu1 %v364_v21  ;;  %v518_v59 = vld [vmem:[#allocation8 + $0xa8] sm:$0xff]  ;;  %v517_v61 = vld [vmem:[#allocation8 + $0xa0] sm:$0xff]  ;;  %v516_v0 = vld [vmem:[#allocation8 + $0x98] sm:$0xff] }
  0x4b   : > { %573 = vmatpush.msra.mxu3 %v525_v43  ;;  %533 = vmatpush.msra.mxu2 %v508_v45  ;;  %v352_v1 = vld [vmem:[%s1294_s11 + $0x38] sm:$0xff]  ;;  %v498_v4 = vld [vmem:[#allocation8 + $0x8] sm:$0xff]  ;;  %v497_v6 = vld [vmem:[#allocation8] sm:$0xff] }
  0x4c   : > { %402 = vmatpush.msra.mxu0 %v361_v22  ;;  %443 = vmatpush.msra.mxu1 %v362_v23  ;;  %v499_v2 = vld [vmem:[#allocation8 + $0x10] sm:$0xff]  ;;  %v514_v5 = vld [vmem:[#allocation8 + $0x88] sm:$0xff]  ;;  %v513_v7 = vld [vmem:[#allocation8 + $0x80] sm:$0xff] }
  0x4d   : > { %574 = vmatpush.msra.mxu3 %v524_v46  ;;  %534 = vmatpush.msra.mxu2 %v507_v47  ;;  %v515_v3 = vld [vmem:[#allocation8 + $0x90] sm:$0xff]  ;;  %v385_v8 = vld [vmem:[#allocation7] sm:$0x3] }
  0x4e   : > { %403 = vmatpush.msra.mxu0 %v359_v24  ;;  %444 = vmatpush.msra.mxu1 %v360_v25  ;;  %v387_v9 = vperm.slane %v385_v8, 0  ;;  %v388_v10 = vperm.slane %v385_v8, 1 }
  0x4f   : > { %575 = vmatpush.msra.mxu3 %v523_v48  ;;  %535 = vmatpush.msra.mxu2 %v506_v49 }
  0x50   : > { %404 = vmatpush.msra.mxu0 %v357_v26  ;;  %445 = vmatpush.msra.mxu1 %v358_v27 }
  0x51   : > { %576 = vmatpush.msra.mxu3 %v522_v50  ;;  %536 = vmatpush.msra.mxu2 %v505_v51 }
  0x52   : > { %405 = vmatpush.msra.mxu0 %v355_v28  ;;  %446 = vmatpush.msra.mxu1 %v356_v29 }
  0x53   : > { %577 = vmatpush.msra.mxu3 %v521_v52  ;;  %537 = vmatpush.msra.mxu2 %v504_v54 }
  0x54   : > { %406 = vmatpush.msra.mxu0 %v353_v30  ;;  %447 = vmatpush.msra.mxu1 %v354_v31 }
  0x55   : > { %407 = vmatmul.f32.vlgmr.msra.gmra.mxu0 %v345_v32  ;;  %448 = vmatmul.f32.vlgmr.msra.gmra.mxu1 %v345_v32 }
  0x56   : > { %578 = vmatpush.msra.mxu3 %v520_v55  ;;  %538 = vmatpush.msra.mxu2 %v503_v56 }
  0x58   : > { %579 = vmatpush.msra.mxu3 %v519_v57  ;;  %539 = vmatpush.msra.mxu2 %v502_v58 }
  0x5a   : > { %580 = vmatpush.msra.mxu3 %v518_v59  ;;  %540 = vmatpush.msra.mxu2 %v501_v60 }
  0x5c   : > { %581 = vmatpush.msra.mxu3 %v517_v61  ;;  %541 = vmatpush.msra.mxu2 %v500_v63 }
  0x5d   : > { %410 = vmatmul.f32.gmra.mxu0 %v346_v33  ;;  %451 = vmatmul.f32.gmra.mxu1 %v346_v33 }
  0x5e   : > { %582 = vmatpush.msra.mxu3 %v516_v0  ;;  %542 = vmatpush.msra.mxu2 %v499_v2 }
  0x60   : > { %583 = vmatpush.msra.mxu3 %v515_v3  ;;  %543 = vmatpush.msra.mxu2 %v498_v4 }
  0x62   : > { %584 = vmatpush.msra.mxu3 %v514_v5  ;;  %544 = vmatpush.msra.mxu2 %v497_v6 }
  0x64   : > { %585 = vmatpush.msra.mxu3 %v513_v7 }
  0x65   : > { %413 = vmatmul.f32.gmra.mxu0 %v347_v34  ;;  %454 = vmatmul.f32.gmra.mxu1 %v347_v34 }
  0x6d   : > { %416 = vmatmul.f32.gmra.mxu0 %v348_v35  ;;  %457 = vmatmul.f32.gmra.mxu1 %v348_v35 }
  0x75   : > { %419 = vmatmul.f32.gmra.mxu0 %v349_v44  ;;  %460 = vmatmul.f32.gmra.mxu1 %v349_v44 }
  0x7d   : > { %422 = vmatmul.f32.gmra.mxu0 %v350_v53  ;;  %463 = vmatmul.f32.gmra.mxu1 %v350_v53 }
  0x85   : > { %425 = vmatmul.f32.gmra.mxu0 %v351_v62  ;;  %466 = vmatmul.f32.gmra.mxu1 %v351_v62  ;;  %v913_v62 = vld [vmem:[%s1374_s4] ss:$0 sm:$0xff] }
  0x8d   : > { %428 = vmatmul.f32.gmra.mxu0 %v352_v1  ;;  %469 = vmatmul.f32.gmra.mxu1 %v352_v1 }
  0xd2   : > { %v408_v11 = vpop.f32.mrf.mxu0  ;;  %v449_v12 = vpop.f32.mrf.mxu1 }
  0xd3   : > { %v409_v13 = vadd.f32 %v408_v11, %v387_v9  ;;  %v450_v14 = vadd.f32 %v449_v12, %v388_v10 }
  0xd5   : > { %v473_v15 = vmax.f32 %v409_v13, 0.0  ;;  %v474_v16 = vmax.f32 %v450_v14, 0.0 }
  0xd7   : > { %545 = vmatmul.f32.vlgmr.msra.gmra.mxu2 %v473_v15  ;;  %586 = vmatmul.f32.vlgmr.msra.gmra.mxu3 %v474_v16 }
  0xda   : > { %v411_v17 = vpop.f32.mrf.mxu0  ;;  %v452_v18 = vpop.f32.mrf.mxu1 }
  0xdb   : > { %v412_v19 = vadd.f32 %v411_v17, %v387_v9  ;;  %v453_v20 = vadd.f32 %v452_v18, %v388_v10 }
  0xdd   : > { %v475_v21 = vmax.f32 %v412_v19, 0.0  ;;  %v476_v22 = vmax.f32 %v453_v20, 0.0 }
  0xdf   : > { %548 = vmatmul.f32.gmra.mxu2 %v475_v21  ;;  %589 = vmatmul.f32.gmra.mxu3 %v476_v22 }
  0xe2   : > { %v414_v23 = vpop.f32.mrf.mxu0  ;;  %v455_v24 = vpop.f32.mrf.mxu1 }
  0xe3   : > { %v415_v25 = vadd.f32 %v414_v23, %v387_v9  ;;  %v456_v26 = vadd.f32 %v455_v24, %v388_v10 }
  0xe5   : > { %v477_v27 = vmax.f32 %v415_v25, 0.0  ;;  %v478_v28 = vmax.f32 %v456_v26, 0.0 }
  0xe7   : > { %551 = vmatmul.f32.gmra.mxu2 %v477_v27  ;;  %592 = vmatmul.f32.gmra.mxu3 %v478_v28 }
  0xea   : > { %v417_v29 = vpop.f32.mrf.mxu0  ;;  %v458_v30 = vpop.f32.mrf.mxu1 }
  0xeb   : > { %v418_v31 = vadd.f32 %v417_v29, %v387_v9  ;;  %v459_v32 = vadd.f32 %v458_v30, %v388_v10 }
  0xed   : > { %v479_v33 = vmax.f32 %v418_v31, 0.0  ;;  %v480_v34 = vmax.f32 %v459_v32, 0.0 }
  0xef   : > { %554 = vmatmul.f32.gmra.mxu2 %v479_v33  ;;  %595 = vmatmul.f32.gmra.mxu3 %v480_v34 }
  0xf2   : > { %v420_v35 = vpop.f32.mrf.mxu0  ;;  %v461_v36 = vpop.f32.mrf.mxu1 }
  0xf3   : > { %v421_v37 = vadd.f32 %v420_v35, %v387_v9  ;;  %v462_v38 = vadd.f32 %v461_v36, %v388_v10 }
  0xf5   : > { %v481_v39 = vmax.f32 %v421_v37, 0.0  ;;  %v482_v40 = vmax.f32 %v462_v38, 0.0 }
  0xf7   : > { %557 = vmatmul.f32.gmra.mxu2 %v481_v39  ;;  %598 = vmatmul.f32.gmra.mxu3 %v482_v40 }
  0xfa   : > { %v423_v41 = vpop.f32.mrf.mxu0  ;;  %v464_v42 = vpop.f32.mrf.mxu1 }
  0xfb   : > { %v424_v43 = vadd.f32 %v423_v41, %v387_v9  ;;  %v465_v44 = vadd.f32 %v464_v42, %v388_v10 }
  0xfd   : > { %v483_v45 = vmax.f32 %v424_v43, 0.0  ;;  %v484_v46 = vmax.f32 %v465_v44, 0.0 }
  0xff   : > { %560 = vmatmul.f32.gmra.mxu2 %v483_v45  ;;  %601 = vmatmul.f32.gmra.mxu3 %v484_v46 }
 0x102   : > { %v426_v47 = vpop.f32.mrf.mxu0  ;;  %v467_v48 = vpop.f32.mrf.mxu1 }
 0x103   : > { %v427_v49 = vadd.f32 %v426_v47, %v387_v9  ;;  %v468_v50 = vadd.f32 %v467_v48, %v388_v10 }
 0x105   : > { %v485_v51 = vmax.f32 %v427_v49, 0.0  ;;  %v486_v52 = vmax.f32 %v468_v50, 0.0 }
 0x107   : > { %563 = vmatmul.f32.gmra.mxu2 %v485_v51  ;;  %604 = vmatmul.f32.gmra.mxu3 %v486_v52 }
 0x10a   : > { %v429_v53 = vpop.f32.mrf.mxu0  ;;  %v470_v54 = vpop.f32.mrf.mxu1 }
 0x10b   : > { %v430_v55 = vadd.f32 %v429_v53, %v387_v9  ;;  %v471_v56 = vadd.f32 %v470_v54, %v388_v10 }
 0x10d   : > { %v487_v57 = vmax.f32 %v430_v55, 0.0  ;;  %v488_v58 = vmax.f32 %v471_v56, 0.0 }
 0x10f   : > { %566 = vmatmul.f32.gmra.mxu2 %v487_v57  ;;  %607 = vmatmul.f32.gmra.mxu3 %v488_v58 }
 0x15a   : > { %v546_v59 = vpop.f32.mrf.mxu2  ;;  %v587_v60 = vpop.f32.mrf.mxu3 }
 0x15b   : > { %v588_v61 = vadd.f32 %v587_v60, %v546_v59 }
 0x15d   : > { %v642_v63 = vadd.f32 %v913_v62, %v588_v61 }
 0x15f   : > { %650 = vst [vmem:[%s1321_s3] sm:$0xff] %v642_v63 }
 0x162   : > { %v549_v0 = vpop.f32.mrf.mxu2  ;;  %v590_v1 = vpop.f32.mrf.mxu3 }
 0x163   : > { %v591_v2 = vadd.f32 %v590_v1, %v549_v0 }
 0x165   : > { %v643_v3 = vadd.f32 %v913_v62, %v591_v2 }
 0x167   : > { %651 = vst [vmem:[%s1321_s3 + $0x8] sm:$0xff] %v643_v3 }
 0x16a   : > { %v552_v4 = vpop.f32.mrf.mxu2  ;;  %v593_v5 = vpop.f32.mrf.mxu3 }
 0x16b   : > { %v594_v6 = vadd.f32 %v593_v5, %v552_v4 }
 0x16d   : > { %v644_v7 = vadd.f32 %v913_v62, %v594_v6 }
 0x16f   : > { %652 = vst [vmem:[%s1321_s3 + $0x10] sm:$0xff] %v644_v7 }
 0x172   : > { %v555_v8 = vpop.f32.mrf.mxu2  ;;  %v596_v9 = vpop.f32.mrf.mxu3 }
 0x173   : > { %v597_v10 = vadd.f32 %v596_v9, %v555_v8 }
 0x175   : > { %v645_v11 = vadd.f32 %v913_v62, %v597_v10 }
 0x177   : > { %653 = vst [vmem:[%s1321_s3 + $0x18] sm:$0xff] %v645_v11 }
 0x17a   : > { %v558_v12 = vpop.f32.mrf.mxu2  ;;  %v599_v13 = vpop.f32.mrf.mxu3 }
 0x17b   : > { %v600_v14 = vadd.f32 %v599_v13, %v558_v12 }
 0x17d   : > { %v646_v15 = vadd.f32 %v913_v62, %v600_v14 }
 0x17f   : > { %654 = vst [vmem:[%s1321_s3 + $0x20] sm:$0xff] %v646_v15 }
 0x182   : > { %v561_v16 = vpop.f32.mrf.mxu2  ;;  %v602_v17 = vpop.f32.mrf.mxu3 }
 0x183   : > { %v603_v18 = vadd.f32 %v602_v17, %v561_v16 }
 0x185   : > { %v647_v19 = vadd.f32 %v913_v62, %v603_v18 }
 0x187   : > { %655 = vst [vmem:[%s1321_s3 + $0x28] sm:$0xff] %v647_v19 }
 0x18a   : > { %v564_v20 = vpop.f32.mrf.mxu2  ;;  %v605_v21 = vpop.f32.mrf.mxu3 }
 0x18b   : > { %v606_v22 = vadd.f32 %v605_v21, %v564_v20 }
 0x18d   : > { %v648_v23 = vadd.f32 %v913_v62, %v606_v22 }
 0x18f   : > { %656 = vst [vmem:[%s1321_s3 + $0x30] sm:$0xff] %v648_v23 }
 0x192   : > { %v567_v24 = vpop.f32.mrf.mxu2  ;;  %v608_v25 = vpop.f32.mrf.mxu3 }
 0x193   : > { %v609_v26 = vadd.f32 %v608_v25, %v567_v24 }
 0x195   : > { %v649_v27 = vadd.f32 %v913_v62, %v609_v26 }
 0x197   : > { %657 = vst [vmem:[%s1321_s3 + $0x38] sm:$0xff] %v649_v27 }
 0x198   : > { %1061 = shalt.err (!%p1058_p0)
}
 0x199   : > { %s1133_s10 = smov 128   ;;  %s1134_s11 = smov 8  }
 0x19a   : > { %827 = dma.vmem_to_hbm [thread:$0]  (%p1257_p3), %s672_s7, 1024, %s674_s16, %s659_s25, %s1133_s10, %s1133_s10, %s1134_s11  }
 0x19b PF: > { %s688_s1 = sand.u32 1, %s1104_s18   ;;  %p844_p5 = pnand %p796_p11, %p1214_p6 }
 0x19c   : > { %s689_s2 = scalar_lea.sflag [#allocation4], %s688_s1 }
 0x19d   : > { %p845_p7 = pneg %p844_p5 }
 0x19f   : > { %1099 = dma.done.wait (%p845_p7), %s689_s2, 1024  }
 0x1a0   : > { %1101 = vsyncadd (%p845_p7), %s689_s2, 4294966272  ;;  %s23_s23 = sadd.s32 1, %s1124_s23   ;;  %s1394_s18 = smov %s1108_s19 }
 0x1a1   : > { %p20_p9 = scmp.ge.s32.totalorder %s23_s23, 4   ;;  %s1395_s19 = smov %s1112_s20 }
 0x1a2   : > { %s1396_s20 = smov %s1273_s27  ;;  %s1397_s21 = smov %s1120_s22 }
 0x1a3   : > { %s1398_s22 = smov %s1400_s15  ;;  %22 = sbr.rel (!%p20_p9) target bundleno = 12 (0xc), region = 108 }
 0x1a8   :  { %695 = vsyncpa [#allocation3], 1 }
 0x1a9   :  { %697 = vsyncpa [#allocation3 + $0x1], 1 }
 0x1aa   :  { %698 = vsyncpa [#allocation6], 1 }
 0x1ab   :  { %699 = vsyncpa [#allocation9], 1 }
 0x1ac   :  { %700 = vsyncpa [#allocation4], 1 }
 0x1ad   :  { %702 = vsyncpa [#allocation4 + $0x1], 1 }

</bundles_post_ra>
